<compile_context>
chip_gen: v7x
topology: tpu7x:2x2x1
jax: 0.10.0
libtpu: 0.0.40
codegen_flags: <defaults>
</compile_context>

<pallas_src>
import functools

import jax
import jax.numpy as jnp
import numpy as np
from jax.experimental import pallas as pl
from jax.experimental.pallas import tpu as pltpu


def _dynopool_kernel(x_ref, s_ref, o_ref):
    # out[m, n] = sum_k x[m, k] * S[k, n]  ==  0.5*(x[m, idx0[n]] + x[m, idx1[n]])
    o_ref[...] = jnp.dot(
        x_ref[...], s_ref[...], preferred_element_type=jnp.float32
    ).astype(o_ref.dtype)


def _round_up(v, m):
    return ((v + m - 1) // m) * m


@functools.lru_cache(maxsize=32)
def _build_pool_matrix(d, ratio, dtype_name):
    """Static selection matrix encoding DynOPool's gather + pairwise mean.

    Cached per (d, ratio, dtype): the O(d*d_) host build and the H2D upload of
    S happen once, not per call.
    """
    ratio = float(ratio)
    # GumbelSoftMax.apply forward = straight-through rounding (discrete dim).
    d_ = int(np.round(d * ratio))
    # indices = (cat(idx+0.25, idx+0.75) * ratio).long()   (.long() truncates)
    idx = np.arange(d_, dtype=np.float64)
    indices = (np.concatenate([idx + 0.25, idx + 0.75]) * ratio).astype(np.int64)
    # ratio > 1 can push floor((i+0.75)*ratio) past d-1 (torch.gather would
    # error there); clamp so the builder never faults.  For ratio <= 1 this is
    # bit-identical to the module.
    indices = np.clip(indices, 0, d - 1)
    # .reshape(b, c, -1, 2).mean(-1) pairs CONSECUTIVE gathered elements.
    idx0 = indices[0::2]
    idx1 = indices[1::2]
    # Lane-dense output: pad the output dim to a multiple of 128 with zero
    # columns so stores are full-width `vst` (no masked partial stores); the
    # wrapper slices the pad off.
    d_pad = max(_round_up(d_, 128), 128)
    S = np.zeros((d, d_pad), dtype=np.float32)
    cols = np.arange(d_)
    np.add.at(S, (idx0, cols), 0.5)
    np.add.at(S, (idx1, cols), 0.5)
    # S entries are exactly {0, 0.5}: lossless in bf16, so match x's dtype to
    # halve S DMA bytes / get native-MXU bf16 when x is bf16, while keeping
    # f32 inputs exact.
    return d_, d_pad, jnp.asarray(S, dtype=jnp.dtype(dtype_name))


def dynopool(x, ratio=1.0):
    """DynOPool forward: (B, C, D) -> (B, C, round(D * ratio))."""
    b, c, d = x.shape
    d_, d_pad, S = _build_pool_matrix(d, float(ratio), jnp.dtype(x.dtype).name)

    m = b * c
    itemsize = jnp.dtype(x.dtype).itemsize
    s_itemsize = jnp.dtype(S.dtype).itemsize
    sublane = 8 * max(1, 4 // itemsize)  # 8 for f32, 16 for bf16, 32 for int8

    # Row tiling: up to 256 rows per block so larger problems get many grid
    # steps (DMA/compute overlap) while tiny ones stay a single aligned block.
    tm = min(256, _round_up(m, sublane))
    m_pad = _round_up(m, tm)
    # Column tiling: lane-dense; 256 fills the v6e/v7x 256-wide MXU, 128 otherwise.
    tn = 256 if d_pad % 256 == 0 else 128

    x2 = x.reshape(m, d)
    if m_pad != m:
        x2 = jnp.pad(x2, ((0, m_pad - m), (0, 0)))

    grid = (m_pad // tm, d_pad // tn)

    # Useful-work hint (2 taps per output element), not the dense-matmul FLOPs
    # that the mostly-zero S would otherwise imply.
    cost = pl.CostEstimate(
        flops=4 * m * d_,
        transcendentals=0,
        bytes_accessed=(m * d + m * d_) * itemsize + d * d_pad * s_itemsize,
    )

    # VMEM budget: double-buffered x / S / out tiles plus headroom; clamp under
    # v7x's 64 MiB physical VMEM.
    need = 2 * (tm * d + tm * tn) * itemsize + 2 * d * tn * s_itemsize
    vmem_limit = int(min(max(2 * need, 32 * 2**20), 48 * 2**20))

    out = pl.pallas_call(
        _dynopool_kernel,
        out_shape=jax.ShapeDtypeStruct((m_pad, d_pad), x.dtype),
        grid_spec=pltpu.PrefetchScalarGridSpec(
            num_scalar_prefetch=0,
            grid=grid,
            in_specs=[
                # x row-tile: block index ignores j, so it stays resident
                # across the inner column axis (fetched once per row tile).
                pl.BlockSpec((tm, d), lambda i, j: (i, 0)),
                # S column tiles stream along j.
                pl.BlockSpec((d, tn), lambda i, j: (0, j)),
            ],
            out_specs=pl.BlockSpec((tm, tn), lambda i, j: (i, j)),
        ),
        compiler_params=pltpu.CompilerParams(
            dimension_semantics=("parallel", "parallel"),
            vmem_limit_bytes=vmem_limit,
        ),
        cost_estimate=cost,
    )(x2, S)

    return out[:m, :d_].reshape(b, c, d_)


def dynopool_ref(x, ratio=1.0):
    """Pure-numpy reference mirroring the PyTorch code path."""
    b, c, d = x.shape
    ratio = float(ratio)
    d_ = int(np.round(d * ratio))
    idx = np.arange(d_, dtype=np.float64)
    indices = (np.concatenate([idx + 0.25, idx + 0.75]) * ratio).astype(np.int64)
    indices = np.clip(indices, 0, d - 1)
    gathered = np.asarray(x)[..., indices]           # torch.gather(x, -1, indices_)
    sampled = gathered.reshape(b, c, -1, 2)          # .reshape(b, c, -1, 2)
    return sampled.mean(-1)                          # .mean(-1)


if __name__ == "__main__":
    key = jax.random.PRNGKey(0)
    # Forward takes (batch, channels, depth); small deterministic example.
    x = jax.random.normal(key, (2, 4, 16), dtype=jnp.float32)
    ratio = 1.0  # deterministic parameter init: nn.init.constant_(self.ratio, 1)

    out = dynopool(x, ratio)
    out = jax.block_until_ready(out)

    ref = dynopool_ref(x, ratio)
    assert out.shape == ref.shape == (2, 4, 16), (out.shape, ref.shape)
    np.testing.assert_allclose(np.asarray(out), ref, rtol=1e-6, atol=1e-6)
    print("KERNEL_OK")
</pallas_src>

<mosaic_0001>
module attributes {stable_mosaic.version = 11 : i64} {
  func.func @_dynopool_kernel(%arg0: i32, %arg1: i32, %arg2: memref<8x16xf32, #tpu.memory_space<vmem>>, %arg3: memref<16x128xf32, #tpu.memory_space<vmem>>, %arg4: memref<8x128xf32, #tpu.memory_space<vmem>>) attributes {dimension_semantics = [#tpu.dimension_semantics<parallel>, #tpu.dimension_semantics<parallel>], iteration_bounds = array<i64: 1, 1>, scalar_prefetch = 0 : i64, scratch_operands = 0 : i64, tpu.core_type = #tpu.core_type<tc>, window_params = [{transform_indices = @transform_0, window_bounds = array<i64: 8, 16>}, {transform_indices = @transform_1, window_bounds = array<i64: 16, 128>}, {transform_indices = @transform_2, window_bounds = array<i64: 8, 128>}]} {
    %c0 = arith.constant 0 : index
    %c0_0 = arith.constant 0 : index
    %0 = vector.load %arg2[%c0, %c0_0] : memref<8x16xf32, #tpu.memory_space<vmem>>, vector<8x16xf32>
    %c0_1 = arith.constant 0 : index
    %c0_2 = arith.constant 0 : index
    %1 = vector.load %arg3[%c0_1, %c0_2] : memref<16x128xf32, #tpu.memory_space<vmem>>, vector<16x128xf32>
    %cst = arith.constant dense<0.000000e+00> : vector<8x128xf32>
    %2 = tpu.matmul %0, %1, %cst {dimension_numbers = #tpu.dot_dimension_numbers<[1], [0], [0], [1], [0, 0, 1, 1], [], []>} : vector<8x16xf32>, vector<16x128xf32>, vector<8x128xf32> -> vector<8x128xf32>
    %c0_3 = arith.constant 0 : index
    %c0_4 = arith.constant 0 : index
    %3 = vector.load %arg4[%c0_3, %c0_4] : memref<8x128xf32, #tpu.memory_space<vmem>>, vector<8x128xf32>
    tpu.vector_store %arg4[%c0_3, %c0_4], %2 {strides = array<i32>} : memref<8x128xf32, #tpu.memory_space<vmem>>, vector<8x128xf32>,
    return
  }
  func.func @transform_0(%arg0: i32, %arg1: i32) -> (i32, i32) {
    %c0_i32 = arith.constant 0 : i32
    %c0_i32_0 = arith.constant 0 : i32
    return %arg0, %c0_i32 : i32, i32
  }
  func.func @transform_1(%arg0: i32, %arg1: i32) -> (i32, i32) {
    %c0_i32 = arith.constant 0 : i32
    %c0_i32_0 = arith.constant 0 : i32
    return %c0_i32, %arg1 : i32, i32
  }
  func.func @transform_2(%arg0: i32, %arg1: i32) -> (i32, i32) {
    %c0_i32 = arith.constant 0 : i32
    return %arg0, %arg1 : i32, i32
  }
}

</mosaic_0001>

<bundles_post_ra>
// kernel: tpu_custom_call.1
= control target key start
LH: loop header
LB: loop body
LE: loop exit
PB: predicated region body
PF: predicated region fallthrough
CT: control target
= control target key end

     0   :  { %7 = vsyncpa [#allocation3], 0  ;;  %s292_s0 = inlined_call_operand.hbm [shape: f32[8,16], index: 0, kind: input, shape index: {}]   ;;  %s293_s1 = inlined_call_operand.hbm [shape: f32[16,128], index: 1, kind: input, shape index: {}]   ;;  %s294_s2 = inlined_call_operand.hbm [shape: f32[8,128], index: 2, kind: output, shape index: {}]  }
   0x1   :  { %8 = vsyncpa [#allocation6], 0 }
   0x2   :  { %9 = vsyncpa [#allocation4], 0  ;;  %s226_s9 = smov [#allocation2]   ;;  %s227_s11 = smov [#allocation5]  }
   0x3   :  { %s16_s10 = sshll.u32 %s226_s9, 4  ;;  %s25_s12 = sshll.u32 %s227_s11, 4  ;;  %s17_s10 = int_to_ptr.vmem [resolvable:$true] %s16_s10  ;;  %s249_s12 = int_to_ptr.vmem [resolvable:$true] %s25_s12 }
   0x4   :  { %s154_s15 = scalar_lea.hbm %s292_s0, 128 }
   0x5   :  { %p155_p0 = scmp.ne.s32.totalorder %s292_s0, %s154_s15  ;;  %p158_p1 = scmp.lt.u32.totalorder %s154_s15, %s292_s0 }
   0x7   :  { %p160_p2 = pnand %p158_p1, %p155_p0 }
   0x9   :  { %163 = shalt.err (!%p160_p2)
}
   0xa   :  { %s164_s20 = scalar_lea.vmem %s17_s10, 128  ;;  %p169_p4 = scmp.lt.s32.totalorder %s17_s10, %s17_s10 }
   0xb   :  { %p165_p3 = scmp.ne.s32.totalorder %s17_s10, %s164_s20  ;;  %p170_p5 = scmp.lt.s32.totalorder %s164_s20, %s164_s20 }
   0xd   :  { %p171_p6 = por %p170_p5, %p169_p4 }
   0xf   :  { %p172_p7 = pnand %p171_p6, %p165_p3 }
  0x11   :  { %175 = shalt.err (!%p172_p7)
}
  0x12   :  { %19 = dma.hbm_to_vmem [thread:$0]  %s292_s0, 128, %s17_s10, [#allocation3]  }
  0x13   :  { %s176_s25 = scalar_lea.hbm %s293_s1, 256 }
  0x14   :  { %p177_p8 = scmp.ne.s32.totalorder %s293_s1, %s176_s25  ;;  %p180_p9 = scmp.lt.u32.totalorder %s176_s25, %s293_s1 }
  0x16   :  { %p182_p10 = pnand %p180_p9, %p177_p8 }
  0x18   :  { %185 = shalt.err (!%p182_p10)
}
  0x19   :  { %s186_s30 = scalar_lea.vmem %s249_s12, 256  ;;  %p191_p12 = scmp.lt.s32.totalorder %s249_s12, %s249_s12 }
  0x1a   :  { %p187_p11 = scmp.ne.s32.totalorder %s249_s12, %s186_s30  ;;  %p192_p13 = scmp.lt.s32.totalorder %s186_s30, %s186_s30 }
  0x1c   :  { %p193_p0 = por %p192_p13, %p191_p12 }
  0x1e   :  { %p194_p1 = pnand %p193_p0, %p187_p11 }
  0x20   :  { %197 = shalt.err (!%p194_p1)
}
  0x21   :  { %s228_s0 = smov 128   ;;  %s229_s3 = smov 8  }
  0x22   :  { %31 = dma.hbm_to_vmem [thread:$0]  %s293_s1, 256, %s249_s12, [#allocation6], %s228_s0, %s228_s0, %s229_s3  }
  0x23   :  { %220 = dma.done.wait [#allocation3], 128  }
  0x24   :  { %221 = vsyncadd [#allocation3], 4294967168 }
  0x25   :  { %222 = dma.done.wait [#allocation6], 256  }
  0x26   :  { %223 = vsyncadd [#allocation6], 4294967040  ;;  %v230_v0 = vmov 0.0|0.0   ;;  %vm231_vm0 = vmmov 0   ;;  %v232_v1 = vmov 0.0   ;;  %v39_v2 = vld [vmem:[#allocation5] sm:$0xff] }
  0x27   :  { %143 = vmatprep.subr.bf16.mxu0 %v230_v0  ;;  %140 = vmatprep.mubr.msk.f32.mxu0 %vm231_vm0, %v232_v1  ;;  %v40_v3 = vld [vmem:[#allocation5 + $0x8] sm:$0xff]  ;;  %v38_v5 = vld [vmem:[#allocation2] sm:$0xff]  ;;  %vm41_vm1 = vcmask 130048   ;;  %s233_s6 = smov [#allocation7]  }
  0x28   :  { %v144_v4 = vpack.c.bf16 %v40_v3, %v39_v2  ;;  %s122_s7 = sshll.u32 %s233_s6, 4  ;;  %s123_s7 = int_to_ptr.vmem [resolvable:$true] %s122_s7 }
  0x29   :  { %s198_s1 = scalar_lea.vmem %s123_s7, 128  ;;  %p203_p3 = scmp.lt.s32.totalorder %s123_s7, %s123_s7 }
  0x2a   :  { %145 = vmatpush3.bf16.msra.mxu0 %v144_v4  ;;  %p199_p2 = scmp.ne.s32.totalorder %s123_s7, %s198_s1  ;;  %p204_p4 = scmp.lt.s32.totalorder %s198_s1, %s198_s1 }
  0x2c   :  { %p205_p5 = por %p204_p4, %p203_p3 }
  0x2d   :  { %141 = vmatmul.mubr.msk.f32.vlgmr.msra.gmra.mrb[0].mxu0 %vm41_vm1, %v38_v5 }
  0x2e   :  { %p206_p6 = pnand %p205_p5, %p199_p2 }
 0x100   :  { %v111_v6 = vpop.f32.mrb[0].mxu0 }
 0x101   :  { %115 = vst [vmem:[#allocation7] sm:$0xff] %v111_v6  ;;  %v142_v7 = vpop.f32.mrb[1].mxu0 }
 0x102   :  { %209 = shalt.err (!%p206_p6)
}
 0x103   :  { %s210_s10 = scalar_lea.hbm %s294_s2, 128 }
 0x104   :  { %p211_p7 = scmp.ne.s32.totalorder %s294_s2, %s210_s10  ;;  %p214_p8 = scmp.lt.u32.totalorder %s210_s10, %s294_s2 }
 0x106   :  { %p216_p9 = pnand %p214_p8, %p211_p7 }
 0x108   :  { %219 = shalt.err (!%p216_p9)
}
 0x109   :  { %125 = dma.vmem_to_hbm [thread:$0]  %s123_s7, 128, %s294_s2, [#allocation4]  }
 0x10a   :  { %224 = dma.done.wait [#allocation4], 128  }
 0x10b   :  { %225 = vsyncadd [#allocation4], 4294967168 }
 0x10c   :  { %129 = vsyncpa [#allocation3], 1 }
 0x10d   :  { %130 = vsyncpa [#allocation6], 1 }
 0x10e   :  { %131 = vsyncpa [#allocation4], 1 }

</bundles_post_ra>
